<compile_context>
chip_gen: v6e
topology: v6e:2x2x1
jax: 0.10.0
libtpu: 0.0.40
codegen_flags: <defaults>
</compile_context>

<pallas_src>
import functools

import numpy as np
import jax
import jax.numpy as jnp
from jax.experimental import pallas as pl
from jax.experimental.pallas import tpu as pltpu

SMOOTH = 1e-5
_LANES = 128
_SUBLANES = 8


# ---------------------------------------------------------------------------
# Host-side (no_grad) distance map — mirrors compute_edts_forPenalizedLoss.
# TODO(synk): Euclidean distance transform has no clean Pallas equivalent
# (data-dependent; done on host with numpy in the reference module too).
# ---------------------------------------------------------------------------
def _edt_bruteforce(mask, chunk=1024):
    """Exact EDT: for each True voxel, distance to nearest False voxel (False -> 0)."""
    shape = mask.shape
    flat = mask.reshape(-1)
    n = flat.shape[0]
    coords = np.stack(
        np.meshgrid(*[np.arange(s) for s in shape], indexing="ij"), axis=-1
    ).reshape(n, len(shape)).astype(np.float64)
    zero_coords = coords[~flat]
    if zero_coords.shape[0] == 0:  # degenerate: no background voxels
        return np.zeros(shape, dtype=np.float64)
    out = np.zeros(n, dtype=np.float64)
    for s in range(0, n, chunk):  # chunked to bound the O(N^2) intermediate
        c = coords[s:s + chunk]
        d2 = ((c[:, None, :] - zero_coords[None, :, :]) ** 2).sum(-1)
        out[s:s + chunk] = np.sqrt(d2.min(axis=1))
    return (out * flat).reshape(shape)


def compute_edts_for_penalized_loss(gt_bool):
    """gt_bool: (B, X, Y, Z) bool -> (B, X, Y, Z) float64 distance penalty map."""
    res = np.zeros(gt_bool.shape, dtype=np.float64)
    for i in range(gt_bool.shape[0]):
        posmask = gt_bool[i]
        negmask = ~posmask
        pos_edt = _edt_bruteforce(posmask)
        pos_edt = (np.max(pos_edt) - pos_edt) * posmask
        neg_edt = _edt_bruteforce(negmask)
        neg_edt = (np.max(neg_edt) - neg_edt) * negmask
        # NOTE: same all-foreground/all-background divide-by-zero hazard as the
        # reference PyTorch module (kept for semantic parity).
        res[i] = pos_edt / np.max(pos_edt) + neg_edt / np.max(neg_edt)
    return res


# ---------------------------------------------------------------------------
# Pallas kernel: per-tile distance-weighted partial sums (tp, sum_p) per batch.
# Grid = (B, R // T); outputs are (8, 128) accumulator tiles per batch element,
# resident across the spatial ("arbitrary") axis.
# ---------------------------------------------------------------------------
def _dice_partial_kernel(net_ref, wdist_ref, tp_ref, sp_ref, *, block_rows):
    r = pl.program_id(1)

    @pl.when(r == 0)
    def _init():
        tp_ref[...] = jnp.zeros_like(tp_ref)
        sp_ref[...] = jnp.zeros_like(sp_ref)

    # 2-class softmax channel 1 == sigmoid(logit1 - logit0)
    z = net_ref[0, 1] - net_ref[0, 0]              # (T, 128) f32
    p1 = 1.0 / (1.0 + jnp.exp(-z))                 # foreground probability
    wdist = wdist_ref[0]                           # (T, 128) = (edt + 1) * onehot_fg

    # Fold T rows down to 8 sublanes with pure VPU (vreg) adds; the single
    # cross-lane/sublane reduction happens once, in the wrapper epilogue.
    g = block_rows // _SUBLANES
    tp_part = jnp.sum((p1 * wdist).reshape(g, _SUBLANES, _LANES), axis=0)
    sp_part = jnp.sum(p1.reshape(g, _SUBLANES, _LANES), axis=0)
    tp_ref[...] += tp_part.reshape(1, _SUBLANES, _LANES)
    sp_ref[...] += sp_part.reshape(1, _SUBLANES, _LANES)


def dist_binary_dice_loss(net_output, gt, smooth=SMOOTH, block_rows=512):
    """net_output: (B, 2, X, Y, Z) float32 ; gt: (B, 1, X, Y, Z) labels in {0,1}."""
    B, C, X, Y, Z = net_output.shape
    assert C == 2
    if gt.ndim == net_output.ndim - 1:
        gt = gt.reshape(B, 1, X, Y, Z)
    assert gt.shape == (B, 1, X, Y, Z)
    S = X * Y * Z

    # ---- host-side (no_grad) work: distance map + label sum ------------------
    # TODO(synk): device->host sync + O(N^2) brute-force EDT (matches the
    # reference module's .cpu().numpy() path) dominates end-to-end wall time.
    gt_np = np.asarray(jax.device_get(gt)).reshape(B, X, Y, Z)
    posmask = gt_np > 0.5
    dist_np = compute_edts_for_penalized_loss(posmask) + 1.0
    wdist_np = (dist_np * posmask).astype(np.float32)                 # (B,X,Y,Z)
    sum_y_np = posmask.reshape(B, -1).sum(axis=1).astype(np.float32)  # (B,)

    # ---- tiling: flatten spatial to (R, 128) lanes, pad R to a tile multiple --
    block_rows = max(_SUBLANES, (block_rows // _SUBLANES) * _SUBLANES)
    R_raw = -(-S // _LANES)                                   # ceil(S / 128)
    if R_raw >= block_rows:
        T = block_rows
    else:
        T = -(-R_raw // _SUBLANES) * _SUBLANES                # round up to 8
    R = -(-R_raw // T) * T                                    # R % T == 0
    S_pad = R * _LANES
    pad = S_pad - S

    net_flat = net_output.astype(jnp.float32).reshape(B, 2, S)
    if pad:
        # zero-padded logits -> p1 = sigmoid(0) = 0.5 exactly; corrected below.
        net_flat = jnp.pad(net_flat, ((0, 0), (0, 0), (0, pad)))
    net_r = net_flat.reshape(B, 2, R, _LANES)

    wdist_flat = wdist_np.reshape(B, S)
    if pad:
        wdist_flat = np.pad(wdist_flat, ((0, 0), (0, pad)))
    wdist_r = jnp.asarray(wdist_flat.reshape(B, R, _LANES), dtype=jnp.float32)

    grid = (B, R // T)
    kernel = functools.partial(_dice_partial_kernel, block_rows=T)
    tp_tiles, sp_tiles = pl.pallas_call(
        kernel,
        out_shape=(
            jax.ShapeDtypeStruct((B, _SUBLANES, _LANES), jnp.float32),
            jax.ShapeDtypeStruct((B, _SUBLANES, _LANES), jnp.float32),
        ),
        grid=grid,
        in_specs=[
            pl.BlockSpec((1, 2, T, _LANES), lambda b, r: (b, 0, r, 0)),
            pl.BlockSpec((1, T, _LANES), lambda b, r: (b, r, 0)),
        ],
        out_specs=(
            pl.BlockSpec((1, _SUBLANES, _LANES), lambda b, r: (b, 0, 0)),
            pl.BlockSpec((1, _SUBLANES, _LANES), lambda b, r: (b, 0, 0)),
        ),
        compiler_params=pltpu.CompilerParams(
            dimension_semantics=("parallel", "arbitrary"),
            vmem_limit_bytes=32 * 1024 * 1024,
        ),
    )(net_r, wdist_r)

    # ---- tiny epilogue: final reduce + Dice ratio + batch mean + negation -----
    tp = jnp.sum(tp_tiles, axis=(1, 2))                   # (B,)
    sum_p = jnp.sum(sp_tiles, axis=(1, 2)) - 0.5 * pad    # remove padded sigmoid(0)
    sum_y = jnp.asarray(sum_y_np)
    dc = (2.0 * tp + smooth) / (sum_p + sum_y + smooth)
    return -jnp.mean(dc)


# ---------------------------------------------------------------------------
# Pure numpy reference (mirrors the PyTorch forward) for a correctness check.
# ---------------------------------------------------------------------------
def _reference_loss(net_np, gt_np, smooth=SMOOTH):
    x = net_np.astype(np.float64)
    x = x - x.max(axis=1, keepdims=True)
    e = np.exp(x)
    p = e / e.sum(axis=1, keepdims=True)
    y1 = (gt_np[:, 0] > 0.5).astype(np.float64)
    dist = compute_edts_for_penalized_loss(gt_np[:, 0] > 0.5) + 1.0
    tp = (p[:, 1] * y1 * dist).sum(axis=(1, 2, 3))
    dc = (2.0 * tp + smooth) / (
        p[:, 1].sum(axis=(1, 2, 3)) + y1.sum(axis=(1, 2, 3)) + smooth
    )
    return -dc.mean()


if __name__ == "__main__":
    key = jax.random.PRNGKey(0)
    k_net, k_gt = jax.random.split(key)

    B, X, Y, Z = 2, 8, 8, 32  # flattened spatial = 2048 = 16 rows of 128 lanes
    net_output = jax.random.normal(k_net, (B, 2, X, Y, Z), dtype=jnp.float32)
    gt = jax.random.bernoulli(k_gt, 0.5, (B, 1, X, Y, Z)).astype(jnp.float32)

    # block_rows=8 -> grid (2, 2): exercises per-batch init + cross-tile accumulation.
    loss = dist_binary_dice_loss(net_output, gt, block_rows=8)
    loss = jax.block_until_ready(loss)

    ref = _reference_loss(np.asarray(net_output), np.asarray(gt))
    assert np.allclose(float(loss), float(ref), rtol=1e-4, atol=1e-5), (float(loss), float(ref))
    print("KERNEL_OK")
</pallas_src>

<mosaic_0001>
module attributes {stable_mosaic.version = 11 : i64} {
  func.func @_dice_partial_kernel(%arg0: i32, %arg1: i32, %arg2: memref<1x2x8x128xf32, #tpu.memory_space<vmem>>, %arg3: memref<1x8x128xf32, #tpu.memory_space<vmem>>, %arg4: memref<1x8x128xf32, #tpu.memory_space<vmem>>, %arg5: memref<1x8x128xf32, #tpu.memory_space<vmem>>) attributes {dimension_semantics = [#tpu.dimension_semantics<parallel>, #tpu.dimension_semantics<arbitrary>], iteration_bounds = array<i64: 2, 2>, scalar_prefetch = 0 : i64, scratch_operands = 0 : i64, tpu.core_type = #tpu.core_type<tc>, window_params = [{transform_indices = @transform_0, window_bounds = array<i64: 1, 2, 8, 128>}, {transform_indices = @transform_1, window_bounds = array<i64: 1, 8, 128>}, {transform_indices = @transform_2, window_bounds = array<i64: 1, 8, 128>}, {transform_indices = @transform_3, window_bounds = array<i64: 1, 8, 128>}]} {
    %c0_i32 = arith.constant 0 : i32
    %0 = arith.cmpi eq, %arg1, %c0_i32 : i32
    %1 = arith.extui %0 : i1 to i32
    %c0_i32_0 = arith.constant 0 : i32
    %2 = arith.cmpi ne, %1, %c0_i32_0 : i32
    scf.if %2 {
      %cst_26 = arith.constant 0.000000e+00 : f32
      %30 = vector.broadcast %cst_26 : f32 to vector<1x8x128xf32>
      %c0_27 = arith.constant 0 : index
      %c0_28 = arith.constant 0 : index
      %c0_29 = arith.constant 0 : index
      %31 = vector.load %arg4[%c0_27, %c0_28, %c0_29] : memref<1x8x128xf32, #tpu.memory_space<vmem>>, vector<1x8x128xf32>
      tpu.vector_store %arg4[%c0_27, %c0_28, %c0_29], %30 {strides = array<i32>} : memref<1x8x128xf32, #tpu.memory_space<vmem>>, vector<1x8x128xf32>,
      %cst_30 = arith.constant 0.000000e+00 : f32
      %32 = vector.broadcast %cst_30 : f32 to vector<1x8x128xf32>
      %c0_31 = arith.constant 0 : index
      %c0_32 = arith.constant 0 : index
      %c0_33 = arith.constant 0 : index
      %33 = vector.load %arg5[%c0_31, %c0_32, %c0_33] : memref<1x8x128xf32, #tpu.memory_space<vmem>>, vector<1x8x128xf32>
      tpu.vector_store %arg5[%c0_31, %c0_32, %c0_33], %32 {strides = array<i32>} : memref<1x8x128xf32, #tpu.memory_space<vmem>>, vector<1x8x128xf32>,
    } else {
    }
    %c0 = arith.constant 0 : index
    %c1 = arith.constant 1 : index
    %c0_1 = arith.constant 0 : index
    %c0_2 = arith.constant 0 : index
    %3 = vector.load %arg2[%c0, %c1, %c0_1, %c0_2] : memref<1x2x8x128xf32, #tpu.memory_space<vmem>>, vector<1x1x8x128xf32>
    %4 = vector.shape_cast %3 : vector<1x1x8x128xf32> to vector<8x128xf32>
    %c0_3 = arith.constant 0 : index
    %c0_4 = arith.constant 0 : index
    %c0_5 = arith.constant 0 : index
    %c0_6 = arith.constant 0 : index
    %5 = vector.load %arg2[%c0_3, %c0_4, %c0_5, %c0_6] : memref<1x2x8x128xf32, #tpu.memory_space<vmem>>, vector<1x1x8x128xf32>
    %6 = vector.shape_cast %5 : vector<1x1x8x128xf32> to vector<8x128xf32>
    %7 = arith.subf %4, %6 : vector<8x128xf32>
    %cst = arith.constant 0.000000e+00 : f32
    %8 = vector.broadcast %cst : f32 to vector<8x128xf32>
    %9 = arith.subf %8, %7 : vector<8x128xf32>
    %10 = math.exp %9 : vector<8x128xf32>
    %cst_7 = arith.constant 1.000000e+00 : f32
    %11 = vector.broadcast %cst_7 : f32 to vector<8x128xf32>
    %12 = arith.addf %11, %10 : vector<8x128xf32>
    %cst_8 = arith.constant 1.000000e+00 : f32
    %13 = vector.broadcast %cst_8 : f32 to vector<8x128xf32>
    %14 = arith.divf %13, %12 : vector<8x128xf32>
    %c0_9 = arith.constant 0 : index
    %c0_10 = arith.constant 0 : index
    %c0_11 = arith.constant 0 : index
    %15 = vector.load %arg3[%c0_9, %c0_10, %c0_11] : memref<1x8x128xf32, #tpu.memory_space<vmem>>, vector<1x8x128xf32>
    %16 = vector.shape_cast %15 : vector<1x8x128xf32> to vector<8x128xf32>
    %17 = arith.mulf %14, %16 : vector<8x128xf32>
    %18 = vector.shape_cast %17 : vector<8x128xf32> to vector<1x8x128xf32>
    %cst_12 = arith.constant dense<0.000000e+00> : vector<8x128xf32>
    %19 = vector.multi_reduction <add>, %18, %cst_12 [0] : vector<1x8x128xf32> to vector<8x128xf32>
    %20 = vector.shape_cast %14 : vector<8x128xf32> to vector<1x8x128xf32>
    %cst_13 = arith.constant dense<0.000000e+00> : vector<8x128xf32>
    %21 = vector.multi_reduction <add>, %20, %cst_13 [0] : vector<1x8x128xf32> to vector<8x128xf32>
    %c0_14 = arith.constant 0 : index
    %c0_15 = arith.constant 0 : index
    %c0_16 = arith.constant 0 : index
    %22 = vector.load %arg4[%c0_14, %c0_15, %c0_16] : memref<1x8x128xf32, #tpu.memory_space<vmem>>, vector<1x8x128xf32>
    %23 = vector.shape_cast %19 : vector<8x128xf32> to vector<1x8x128xf32>
    %24 = arith.addf %22, %23 : vector<1x8x128xf32>
    %c0_17 = arith.constant 0 : index
    %c0_18 = arith.constant 0 : index
    %c0_19 = arith.constant 0 : index
    %25 = vector.load %arg4[%c0_17, %c0_18, %c0_19] : memref<1x8x128xf32, #tpu.memory_space<vmem>>, vector<1x8x128xf32>
    tpu.vector_store %arg4[%c0_17, %c0_18, %c0_19], %24 {strides = array<i32>} : memref<1x8x128xf32, #tpu.memory_space<vmem>>, vector<1x8x128xf32>,
    %c0_20 = arith.constant 0 : index
    %c0_21 = arith.constant 0 : index
    %c0_22 = arith.constant 0 : index
    %26 = vector.load %arg5[%c0_20, %c0_21, %c0_22] : memref<1x8x128xf32, #tpu.memory_space<vmem>>, vector<1x8x128xf32>
    %27 = vector.shape_cast %21 : vector<8x128xf32> to vector<1x8x128xf32>
    %28 = arith.addf %26, %27 : vector<1x8x128xf32>
    %c0_23 = arith.constant 0 : index
    %c0_24 = arith.constant 0 : index
    %c0_25 = arith.constant 0 : index
    %29 = vector.load %arg5[%c0_23, %c0_24, %c0_25] : memref<1x8x128xf32, #tpu.memory_space<vmem>>, vector<1x8x128xf32>
    tpu.vector_store %arg5[%c0_23, %c0_24, %c0_25], %28 {strides = array<i32>} : memref<1x8x128xf32, #tpu.memory_space<vmem>>, vector<1x8x128xf32>,
    return
  }
  func.func @transform_0(%arg0: i32, %arg1: i32) -> (i32, i32, i32, i32) {
    %c0_i32 = arith.constant 0 : i32
    %c0_i32_0 = arith.constant 0 : i32
    %c0_i32_1 = arith.constant 0 : i32
    return %arg0, %c0_i32, %arg1, %c0_i32_0 : i32, i32, i32, i32
  }
  func.func @transform_1(%arg0: i32, %arg1: i32) -> (i32, i32, i32) {
    %c0_i32 = arith.constant 0 : i32
    %c0_i32_0 = arith.constant 0 : i32
    return %arg0, %arg1, %c0_i32 : i32, i32, i32
  }
  func.func @transform_2(%arg0: i32, %arg1: i32) -> (i32, i32, i32) {
    %c0_i32 = arith.constant 0 : i32
    %c0_i32_0 = arith.constant 0 : i32
    %c0_i32_1 = arith.constant 0 : i32
    return %arg0, %c0_i32, %c0_i32_0 : i32, i32, i32
  }
  func.func @transform_3(%arg0: i32, %arg1: i32) -> (i32, i32, i32) {
    %c0_i32 = arith.constant 0 : i32
    %c0_i32_0 = arith.constant 0 : i32
    %c0_i32_1 = arith.constant 0 : i32
    return %arg0, %c0_i32, %c0_i32_0 : i32, i32, i32
  }
}

</mosaic_0001>

<bundles_post_ra>
// kernel: tpu_custom_call.1
= control target key start
LH: loop header
LB: loop body
LE: loop exit
PB: predicated region body
PF: predicated region fallthrough
CT: control target
= control target key end

     0   :  { %s1093_s0 = inlined_call_operand.hbm [shape: f32[2,2,16,128], index: 0, kind: input, shape index: {}]   ;;  %s1094_s1 = inlined_call_operand.hbm [shape: f32[2,16,128], index: 1, kind: input, shape index: {}]   ;;  %s1095_s2 = inlined_call_operand.hbm [shape: f32[2,8,128], index: 2, kind: output, shape index: {0}]   ;;  %s1096_s3 = inlined_call_operand.hbm [shape: f32[2,8,128], index: 3, kind: output, shape index: {1}]  }
   0x1   :  { %1104 = sst [smem:[#allocation22_spill]] %s1093_s0 }
   0x2   :  { %1105 = sst [smem:[#allocation23_spill]] %s1095_s2 }
   0x3   :  { %9 = vsyncpa [#allocation3], 0 }
   0x4   :  { %11 = vsyncpa [#allocation3 + $0x1], 0 }
   0x5   :  { %12 = vsyncpa [#allocation6], 0 }
   0x6   :  { %14 = vsyncpa [#allocation6 + $0x1], 0 }
   0x7   :  { %15 = vsyncpa [#allocation4], 0 }
   0x8   :  { %17 = vsyncpa [#allocation4 + $0x1], 0 }
   0x9   :  { %18 = vsyncpa [#allocation9], 0 }
   0xa   :  { %20 = vsyncpa [#allocation9 + $0x1], 0  ;;  %s837_s12 = smov 0   ;;  %s839_s13 = smov 0  }
   0xb   :  { %s841_s14 = smov 0   ;;  %s843_s15 = smov 0  }
   0xc   :  { %s845_s16 = smov 0   ;;  %s847_s17 = smov 0  }
   0xd   :  { %s849_s18 = smov 0   ;;  %s851_s19 = smov 0  }
   0xe   :  { %s853_s20 = smov 0   ;;  %s855_s21 = smov 0  }
   0xf   :  { %s857_s22 = smov 0  }
  0x10 LB: > { %1106 = sst [smem:[#allocation14_spill]] %s767_s12  ;;  %s454_s23 = sadd.s32 4294967295, %s807_s22   ;;  %s807_s22 = sphi %s857_s22, %s26_s22   ;;  %s803_s21 = sphi %s855_s21, %s1137_s21   ;;  %s799_s20 = sphi %s853_s20, %s1136_s20   ;;  %s795_s19 = sphi %s851_s19, %s1135_s19   ;;  %s791_s18 = sphi %s849_s18, %s1134_s18   ;;  %s787_s17 = sphi %s847_s17, %s1127_s17   ;;  %s783_s16 = sphi %s845_s16, %s1133_s16   ;;  %s779_s15 = sphi %s843_s15, %s1132_s15   ;;  %s775_s14 = sphi %s841_s14, %s1125_s14   ;;  %s771_s13 = sphi %s839_s13, %s1131_s13   ;;  %s767_s12 = sphi %s837_s12, %s1130_s12  }
  0x11   : > { %1107 = sst [smem:[#allocation15_spill]] %s775_s14  ;;  %s455_s24 = sadd.s32 4294967294, %s807_s22  }
  0x12   : > { %1108 = sst [smem:[#allocation16_spill]] %s787_s17  ;;  %s35_s25 = sadd.s32 1, %s799_s20 }
  0x13   : > { %s38_s26 = sadd.s32 1, %s803_s21  ;;  %p36_p0 = scmp.ge.s32.totalorder %s35_s25, 2 }
  0x14   : > { %s47_s27 = sadd.s32 1, %s787_s17  ;;  %p54_p1 = scmp.ne.s32.totalorder %s787_s17, %s783_s16 }
  0x15   : > { %p55_p2 = scmp.eq.s32.totalorder %s807_s22, 0  ;;  %s1139_s25 = smov (%p36_p0, %s35_s25), 0 }
  0x16   : > { %1109 = sst [smem:[#allocation17_spill]] %s1139_s25  ;;  %s1141_s26 = smov (!%p36_p0, %s38_s26), %s803_s21 }
  0x17   : > { %s43_s28 = ssub.s32 %s799_s20, %s1139_s25  ;;  %p903_p3 = por %p55_p2, %p54_p1 }
  0x18   : > { %p40_p4 = scmp.ge.s32.totalorder %s1141_s26, 2  ;;  %p60_p5 = scmp.ne.s32.totalorder %s783_s16, %s779_s15 }
  0x19   : > { %p61_p6 = scmp.eq.s32.totalorder %s454_s23, 0  ;;  %s101_s30 = sadd.s32 1, %s775_s14 }
  0x1a   : > { %s1143_s26 = smov (%p40_p4, %s1141_s26), 0  ;;  %p111_p8 = scmp.ne.s32.totalorder %s775_s14, %s771_s13 }
  0x1b   : > { %1111 = sst [smem:[#allocation18_spill]] %s1143_s26  ;;  %p911_p7 = por %p61_p6, %p60_p5 }
  0x1c   : > { %s42_s5 = ssub.s32 %s803_s21, %s1143_s26  ;;  %p112_p9 = scmp.eq.s32.totalorder %s454_s23, 3 }
  0x1d   : > { %s44_s6 = sor.u32 %s43_s28, %s42_s5  ;;  %p99_p10 = scmp.eq.s32.totalorder %s42_s5, 0 }
  0x1e   : > { %p45_p11 = scmp.eq.s32.totalorder %s44_s6, 0  ;;  %p919_p12 = por %p112_p9, %p111_p8 }
  0x1f   : > { %s924_s8 = scalar_select %p99_p10, %s775_s14, %s101_s30  }
  0x20   : > { %s927_s9 = scalar_select %p45_p11, %s787_s17, %s47_s27  }
  0x21   : > { %1114 = sst [smem:[#allocation19_spill]] %s924_s8  ;;  %p117_p13 = scmp.ne.s32.totalorder %s771_s13, %s767_s12 }
  0x22   : > { %1115 = sst [smem:[#allocation20_spill]] %s927_s9  ;;  %p118_p0 = scmp.eq.s32.totalorder %s455_s24, 3 }
  0x23   : > { %p499_p1 = scmp.lt.s32.totalorder %s807_s22, 4  ;;  %s937_s11 = sand.u32 1, %s787_s17  }
  0x24   : > { %p932_p2 = por %p118_p0, %p117_p13  ;;  %s458_s15 = sshll.u32 %s937_s11, 4 }
  0x25   : > { %s459_s23 = sshll.u32 %s803_s21, 2  ;;  %s168_s5 = scalar_lea.vmem [#allocation2], %s458_s15 }
  0x26   : > { %s1116_s10 = scalar_select %p932_p2, 1, 0 }
  0x27   : > { %s173_s28 = sadd.s32 %s799_s20, %s459_s23  ;;  %s176_s6 = sshll.u32 %s168_s5, 4  ;;  %s177_s6 = int_to_ptr.vmem [resolvable:$true] %s176_s6 }
  0x28   : > { %1117 = sst [smem:[#allocation21_spill]] %s1116_s10  ;;  %s460_s30 = sshll.u32 %s173_s28, 7 }
  0x29   : > { %s1118_s0 = sld [smem:[#allocation22_spill]]  ;;  %p947_p4 = pnand %p499_p1, %p903_p3 }
  0x2a   : > { %s165_s9 = scalar_lea.sflag [#allocation3], %s937_s11  ;;  %s610_s17 = scalar_lea.vmem %s177_s6, 256 }
  0x2b   : > { %p599_p5 = pneg %p947_p4  ;;  %p611_p6 = scmp.ne.s32.totalorder %s177_s6, %s610_s17 }
  0x2c   : > { %s809_s15 = smov [#allocation2]  }
  0x2d   : > { %p613_p8 = pnand %p611_p6, %p599_p5  ;;  %s615_s23 = sshll.u32 %s809_s15, 4  ;;  %s616_s23 = int_to_ptr.vmem [resolvable:$false] %s615_s23 }
  0x2e   : > { %s617_s26 = scalar_lea.vmem %s616_s23, 512  ;;  %p618_p10 = scmp.lt.s32.totalorder %s177_s6, %s616_s23 }
  0x2f   : > { %s175_s24 = scalar_lea.hbm %s1118_s0, %s460_s30  ;;  %p614_p9 = pneg %p613_p8 }
  0x30   : > { %p619_p3 = scmp.lt.s32.totalorder %s617_s26, %s610_s17 }
  0x32   : > { %p620_p11 = por %p619_p3, %p618_p10 }
  0x34   : > { %p621_p13 = pnand %p620_p11, %p614_p9 }
  0x36   : > { %624 = shalt.err (!%p621_p13)
}
  0x37   : > { %s810_s29 = smov 256   ;;  %s811_s28 = smov 128  }
  0x38   : > { %s812_s5 = smov 8   ;;  %p464_p0 = scmp.ge.s32.totalorder %s807_s22, 1 }
  0x39   : > { %488 = dma.hbm_to_vmem [thread:$0]  (!%p947_p4), %s175_s24, 256, %s177_s6, %s165_s9, %s810_s29, %s811_s28, %s812_s5  }
  0x3a   : > { %p204_p1 = scmp.lt.s32.totalorder %s807_s22, 5  ;;  %s461_s30 = sshll.u32 %s937_s11, 3 }
  0x3b   : > { %s462_s27 = sshll.u32 %s803_s21, 1  ;;  %s190_s15 = scalar_lea.vmem [#allocation5], %s461_s30 }
  0x3c   : > { %p962_p6 = pnand %p464_p0, %p204_p1  ;;  %s199_s23 = sshll.u32 %s190_s15, 4  ;;  %s200_s23 = int_to_ptr.vmem [resolvable:$true] %s199_s23 }
  0x3d   : > { %s195_s26 = sadd.s32 %s799_s20, %s462_s27  ;;  %s187_s12 = scalar_lea.sflag [#allocation6], %s937_s11 }
  0x3e   : > { %s463_s0 = sshll.u32 %s195_s26, 7  ;;  %s638_s2 = scalar_lea.vmem %s200_s23, 128 }
  0x3f   : > { %s197_s10 = scalar_lea.hbm %s1094_s1, %s463_s0  ;;  %p639_p8 = scmp.ne.s32.totalorder %s200_s23, %s638_s2 }
  0x40   : > { %s813_s9 = smov [#allocation5]  }
  0x41   : > { %p641_p9 = pnand %p639_p8, %p599_p5  ;;  %s643_s6 = sshll.u32 %s813_s9, 4  ;;  %s644_s6 = int_to_ptr.vmem [resolvable:$false] %s643_s6 }
  0x42   : > { %s645_s24 = scalar_lea.vmem %s644_s6, 256  ;;  %p646_p3 = scmp.lt.s32.totalorder %s200_s23, %s644_s6 }
  0x43   : > { %p642_p10 = pneg %p641_p9  ;;  %p647_p11 = scmp.lt.s32.totalorder %s645_s24, %s638_s2 }
  0x45   : > { %p648_p13 = por %p647_p11, %p646_p3 }
  0x47   : > { %p649_p0 = pnand %p648_p13, %p642_p10 }
  0x49   : > { %652 = shalt.err (!%p649_p0)
}
  0x4a   : > { %491 = dma.hbm_to_vmem [thread:$0]  (!%p947_p4), %s197_s10, 128, %s200_s23, %s187_s12  }
  0x4b   : > { %208 = sbr.rel (%p962_p6) target bundleno = 168 (0xa8), region = 28  ;;  %s210_s0 = sand.u32 (!%p962_p6), 1, %s783_s16  }
  0x4c   : > { %s465_s14 = sshll.u32 (!%p962_p6), %s210_s0, 4  ;;  %s211_s8 = scalar_lea.sflag (!%p962_p6), [#allocation3], %s210_s0 }
  0x4d   : > { %s214_s11 = scalar_lea.vmem (!%p962_p6), [#allocation2], %s465_s14 }
  0x50   : > { %750 = dma.done.wait (%p911_p7), %s211_s8, 256  }
  0x51   : > { %752 = vsyncadd (%p911_p7), %s211_s8, 4294967040  ;;  %s466_s2 = sshll.u32 %s210_s0, 3  ;;  %s220_s29 = scalar_lea.sflag [#allocation6], %s210_s0 }
  0x52   : > { %s223_s28 = scalar_lea.vmem [#allocation5], %s466_s2 }
  0x53   : > { %754 = dma.done.wait (%p911_p7), %s220_s29, 128  }
  0x54   : > { %756 = vsyncadd (%p911_p7), %s220_s29, 4294967168  ;;  %s989_s12 = sand.u32 1, %s771_s13   ;;  %p469_p4 = scmp.ne.s32.totalorder %s791_s18, 0 }
  0x55   : > { %s467_s25 = sshll.u32 %s989_s12, 3 }
  0x56   : > { %s992_s10 = scalar_lea.vmem [#allocation7], %s467_s25  ;;  %s255_s5 = scalar_lea.vmem [#allocation8], %s467_s25 }
  0x57   : > { %259 = sbr.rel (%p469_p4) target bundleno = 94 (0x5e), region = 40 }
  0x5c   : > { %v814_v0 = vmov 0.0  }
  0x5d   : > { %260 = vst [vmem:[%s992_s10] sm:$0xff] %v814_v0  ;;  %261 = vst [vmem:[%s255_s5] sm:$0xff] %v814_v0 }
  0x5e PF: > { %v470_v1 = vld [vmem:[%s214_s11 + $0x8] sm:$0xff]  ;;  %v264_v2 = vld [vmem:[%s214_s11] sm:$0xff]  ;;  %s473_s18 = sshll.u32 %s795_s19, 7  ;;  %s314_s4 = sshll.u32 %s255_s5, 4  ;;  %s1004_s4 = int_to_ptr.vmem [resolvable:$true] %s314_s4 }
  0x5f   : > { %v265_v3 = vsub.f32 %v470_v1, %v264_v2  ;;  %v272_v8 = vld [vmem:[%s223_s28] sm:$0xff]  ;;  %s301_s30 = sshll.u32 %s992_s10, 4  ;;  %s1002_s15 = scalar_lea.hbm %s1096_s3, %s473_s18  ;;  %s1011_s30 = int_to_ptr.vmem [resolvable:$true] %s301_s30 }
  0x60   : > { %s1121_s26 = sld [smem:[#allocation23_spill]]  ;;  %s288_s6 = scalar_lea.sflag [#allocation9], %s989_s12 }
  0x61   : > { %v266_v4 = vsub.f32 0.0, %v265_v3  ;;  %s653_s24 = scalar_lea.vmem %s1004_s4, 128  ;;  %s815_s0 = smov [#allocation8]  }
  0x62   : > { %p654_p7 = scmp.ne.s32.totalorder %s1004_s4, %s653_s24  ;;  %s657_s14 = sshll.u32 %s815_s0, 4  ;;  %s658_s14 = int_to_ptr.vmem [resolvable:$false] %s657_s14 }
  0x63   : > { %v267_v5 = vmul.f32 1.442695, %v266_v4  ;;  %s659_s8 = scalar_lea.vmem %s658_s14, 256  ;;  %p660_p6 = scmp.lt.s32.totalorder %s1004_s4, %s658_s14 }
  0x64   : > { %v279_v9 = vld [vmem:[%s255_s5] sm:$0xff]  ;;  %v276_v11 = vld [vmem:[%s992_s10] sm:$0xff]  ;;  %p655_p5 = pnand %p654_p7, %p919_p12  ;;  %p661_p8 = scmp.lt.s32.totalorder %s659_s8, %s653_s24 }
  0x65   : > { %593 = vpow2.f32 %v267_v5 }
  0x66   : > { %s1009_s9 = scalar_lea.hbm %s1121_s26, %s473_s18  ;;  %p656_p1 = pneg %p655_p5 }
  0x67   : > { %p662_p9 = por %p661_p8, %p660_p6 }
  0x69   : > { %p663_p10 = pnand %p662_p9, %p656_p1 }
  0x72   : > { %v594_v6 = vpop.eup %593 }
  0x73   : > { %v269_v7 = vadd.f32 1.0, %v594_v6 }
  0x75   : > { %595 = vrcp.f32 %v269_v7 }
  0x82   : > { %v596_v10 = vpop.eup %595 }
  0x83   : > { %v273_v12 = vmul.f32 %v596_v10, %v272_v8  ;;  %v280_v13 = vadd.f32 %v596_v10, %v279_v9 }
  0x85   : > { %v277_v14 = vadd.f32 %v276_v11, %v273_v12  ;;  %281 = vst [vmem:[%s255_s5] sm:$0xff] %v280_v13 }
  0x86   : > { %666 = shalt.err (!%p663_p10)
}
  0x87   : > { %s667_s11 = scalar_lea.hbm %s1002_s15, 128  ;;  %s671_s28 = scalar_lea.hbm %s1096_s3, 256 }
  0x88   : > { %p668_p3 = scmp.ne.s32.totalorder %s1002_s15, %s667_s11  ;;  %p672_p0 = scmp.lt.s32.totalorder %s1002_s15, %s1096_s3 }
  0x89   : > { %p673_p4 = scmp.lt.s32.totalorder %s671_s28, %s667_s11 }
  0x8a   : > { %p669_p11 = pnand %p668_p3, %p919_p12 }
  0x8b   : > { %p674_p7 = por %p673_p4, %p672_p0 }
  0x8c   : > { %p670_p13 = pneg %p669_p11 }
  0x8e   : > { %p675_p5 = pnand %p674_p7, %p670_p13 }
  0x90   : > { %678 = shalt.err (!%p675_p5)
}
  0x91   : > { %482 = dma.vmem_to_hbm [thread:$0]  (%p919_p12), %s1004_s4, 128, %s1002_s15, %s288_s6   ;;  %278 = vst [vmem:[%s992_s10] sm:$0xff] %v277_v14 }
  0x92   : > { %s283_s18 = scalar_lea.sflag [#allocation4], %s989_s12  ;;  %s679_s17 = scalar_lea.vmem %s1011_s30, 128 }
  0x93   : > { %p680_p1 = scmp.ne.s32.totalorder %s1011_s30, %s679_s17  ;;  %s816_s27 = smov [#allocation7]  }
  0x94   : > { %s683_s19 = sshll.u32 %s816_s27, 4  ;;  %s684_s19 = int_to_ptr.vmem [resolvable:$false] %s683_s19 }
  0x95   : > { %p681_p6 = pnand %p680_p1, %p919_p12  ;;  %s685_s23 = scalar_lea.vmem %s684_s19, 256 }
  0x96   : > { %p686_p9 = scmp.lt.s32.totalorder %s1011_s30, %s684_s19  ;;  %p687_p10 = scmp.lt.s32.totalorder %s685_s23, %s679_s17 }
  0x97   : > { %p682_p8 = pneg %p681_p6 }
  0x98   : > { %p688_p3 = por %p687_p10, %p686_p9 }
  0x9a   : > { %p689_p11 = pnand %p688_p3, %p682_p8 }
  0x9c   : > { %692 = shalt.err (!%p689_p11)
}
  0x9d   : > { %s693_s10 = scalar_lea.hbm %s1009_s9, 128  ;;  %s697_s15 = scalar_lea.hbm %s1121_s26, 256 }
  0x9e   : > { %p694_p13 = scmp.ne.s32.totalorder %s1009_s9, %s693_s10  ;;  %p698_p7 = scmp.lt.s32.totalorder %s1009_s9, %s1121_s26 }
  0x9f   : > { %p699_p5 = scmp.lt.s32.totalorder %s697_s15, %s693_s10 }
  0xa0   : > { %p695_p0 = pnand %p694_p13, %p919_p12 }
  0xa1   : > { %p700_p1 = por %p699_p5, %p698_p7 }
  0xa2   : > { %p696_p4 = pneg %p695_p0 }
  0xa4   : > { %p701_p6 = pnand %p700_p1, %p696_p4 }
  0xa6   : > { %704 = shalt.err (!%p701_p6)
}
  0xa7   : > { %481 = dma.vmem_to_hbm [thread:$0]  (%p919_p12), %s1011_s30, 128, %s1009_s9, %s283_s18  }
  0xa8 PF: > { %s1122_s0 = sld [smem:[#allocation14_spill]]  ;;  %p500_p8 = scmp.ge.s32.totalorder %s807_s22, 2 }
  0xaa   : > { %p493_p9 = pnand %p500_p8, %p932_p2 }
  0xac   : > { %p494_p10 = pneg %p493_p9 }
  0xae   : > { %s326_s8 = sand.u32 1, %s1122_s0  }
  0xaf   : > { %s327_s11 = scalar_lea.sflag [#allocation4], %s326_s8 }
  0xb0   : > { %758 = dma.done.wait (%p494_p10), %s327_s11, 128  }
  0xb1   : > { %760 = vsyncadd (%p494_p10), %s327_s11, 4294967168  ;;  %s336_s2 = scalar_lea.sflag [#allocation9], %s326_s8 }
  0xb2   : > { %762 = dma.done.wait (%p494_p10), %s336_s2, 128  }
  0xb3   : > { %764 = vsyncadd (%p494_p10), %s336_s2, 4294967168  ;;  %s26_s22 = sadd.s32 1, %s807_s22   ;;  %s1124_s7 = sld [smem:[#allocation15_spill]] }
  0xb4   : > { %p23_p3 = scmp.ge.s32.totalorder %s26_s22, 6   ;;  %s1125_s14 = sld [smem:[#allocation19_spill]] }
  0xb5   : > { %s1126_s30 = sld [smem:[#allocation16_spill]]  ;;  %s1130_s12 = smov %s771_s13 }
  0xb6   : > { %s1127_s17 = sld [smem:[#allocation20_spill]]  ;;  %s1132_s15 = smov %s783_s16 }
  0xb7   : > { %s1128_s9 = sld [smem:[#allocation17_spill]]  ;;  %s1134_s18 = smov %s799_s20 }
  0xb8   : > { %s1129_s29 = sld [smem:[#allocation18_spill]]  ;;  %s1135_s19 = smov %s803_s21 }
  0xb9   : > { %s1131_s13 = smov %s1124_s7 }
  0xba   :  { %25 = sbr.rel (!%p23_p3) target bundleno = 16 (0x10), region = 108 }
  0xbb   : > { %s1133_s16 = smov %s1126_s30 }
  0xbd   : > { %s1136_s20 = smov %s1128_s9 }
  0xbe   : > { %s1137_s21 = smov %s1129_s29 }
  0xbf   :  { %341 = vsyncpa [#allocation3], 1 }
  0xc0   :  { %343 = vsyncpa [#allocation3 + $0x1], 1 }
  0xc1   :  { %344 = vsyncpa [#allocation6], 1 }
  0xc2   :  { %346 = vsyncpa [#allocation6 + $0x1], 1 }
  0xc3   :  { %347 = vsyncpa [#allocation4], 1 }
  0xc4   :  { %349 = vsyncpa [#allocation4 + $0x1], 1 }
  0xc5   :  { %350 = vsyncpa [#allocation9], 1 }
  0xc6   :  { %352 = vsyncpa [#allocation9 + $0x1], 1 }

</bundles_post_ra>
